<compile_context>
chip_gen: v7x
topology: tpu7x:2x2x1
jax: 0.10.0
libtpu: 0.0.40
codegen_flags: <defaults>
</compile_context>

<pallas_src>
import functools

import jax
import jax.numpy as jnp
from jax import lax
from jax.experimental import pallas as pl
from jax.experimental.pallas import tpu as pltpu


def _round_up(x, m):
    return ((x + m - 1) // m) * m


def _sinkloss_kernel(a_ref, valid_ref, c_ref, ct_ref, bbig_ref, lbdbig_ref,
                     loss_ref,
                     u_ref, v_ref, yhat_ref, active_ref,
                     *, K, Bt, numItermax, stopThr):
    """One grid step: Sinkhorn barycenter loop for a tile of Bt documents.

    Row layout of the (K*Bt, N) state: row k*Bt + j  <->  (topic k, doc j).
    N lives on lanes; topic/doc slabs are sublane-contiguous.
    """
    N = c_ref.shape[0]
    KB = K * Bt

    # --- per-tile init -------------------------------------------------------
    u_ref[...] = jnp.ones((KB, N), jnp.float32)
    v_ref[...] = jnp.ones((KB, N), jnp.float32)
    yhat_ref[...] = jnp.zeros((Bt, N), jnp.float32)
    active_ref[...] = valid_ref[...]          # 1.0 real doc, 0.0 padding doc

    b_big = bbig_ref[...]                     # (K*Bt, N) topic dists (doc-replicated)
    lbd_big = lbdbig_ref[...]                 # (K*Bt, 1) per-doc barycenter weights

    def doc_sum(x):
        """(K*Bt, X) -> (Bt, X): sum over the K topic slabs (K-1 vector adds)."""
        acc = x[0:Bt]
        for k in range(1, K):
            acc = acc + x[k * Bt:(k + 1) * Bt]
        return acc

    def cond_fn(carry):
        cpt, go = carry
        return jnp.logical_and(cpt < numItermax, go > 0)

    def body_fn(carry):
        cpt, _ = carry
        active = active_ref[...] > 0.0        # (Bt, 1) bool
        u_prev = u_ref[...]                   # (K*Bt, N)
        v_prev = v_ref[...]

        # --- one Sinkhorn step for every doc of the tile (big MXU dots) -------
        # Cu^T = u^T @ C^T ; v^T = (b / Cu)^T @ C
        Cu = jnp.dot(u_prev, ct_ref[...], preferred_element_type=jnp.float32)
        r = b_big / Cu
        v_new = jnp.dot(r, c_ref[...], preferred_element_type=jnp.float32)

        # prod_k v_k ** lbd_k == exp(sum_k lbd_k * log v_k); sum over topic slabs.
        wlog = lbd_big * jnp.log(v_new)                       # (K*Bt, N)
        yhat_new = jnp.exp(doc_sum(wlog))                     # (Bt, N)
        u_new = jnp.tile(yhat_new, (K, 1)) / v_new            # (K*Bt, N)

        # --- per-doc numerical-error guard (NaN/Inf in v/yhat propagate into u)
        bad_elem = (Cu == 0.0) | jnp.isnan(u_new) | jnp.isinf(u_new)
        bad_row = jnp.max(bad_elem.astype(jnp.float32), axis=1, keepdims=True)
        bad = doc_sum(bad_row) > 0.0                          # (Bt, 1) bool

        accept = jnp.logical_and(active, jnp.logical_not(bad))   # (Bt, 1)
        accept_f = accept.astype(jnp.float32)
        accept_kb = jnp.tile(accept_f, (K, 1)) > 0.0              # (K*Bt, 1)

        # accepted step for live docs; frozen (revert) for bad / finished docs
        u_ref[...] = jnp.where(accept_kb, u_new, u_prev)
        v_ref[...] = jnp.where(accept_kb, v_new, v_prev)
        yhat_ref[...] = jnp.where(accept, yhat_new, yhat_ref[...])

        # docs that hit a numerical error stop here ('revert and break')
        active_ref[...] = accept_f

        # convergence check only every 10th iteration (matches the torch loop)
        @pl.when(cpt % 10 == 0)
        def _():
            du = u_new - u_prev
            dv = v_new - v_prev
            lhs = (doc_sum(jnp.sum(du * du, axis=1, keepdims=True)) /
                   doc_sum(jnp.sum(u_new * u_new, axis=1, keepdims=True)))
            rhs = (doc_sum(jnp.sum(dv * dv, axis=1, keepdims=True)) /
                   doc_sum(jnp.sum(v_new * v_new, axis=1, keepdims=True)))
            err = lhs + rhs                                   # (Bt, 1)
            still = jnp.logical_and(accept, err > jnp.float32(stopThr))
            active_ref[...] = still.astype(jnp.float32)

        go_new = (jnp.max(active_ref[...]) > 0.0).astype(jnp.int32)
        return (cpt + 1, go_new)

    go0 = (jnp.max(active_ref[...]) > 0.0).astype(jnp.int32)
    lax.while_loop(cond_fn, body_fn, (jnp.int32(0), go0))

    # loss_b = || yhat_b - a_b ||_F ** 2
    diff = yhat_ref[...] - a_ref[...]                         # (Bt, N)
    loss_ref[...] = jnp.sum(diff * diff, axis=1, keepdims=True)


class WasserIndexGen:
    """JAX/Pallas port of wigpy.model.WasserIndexGen (forward pass only)."""

    def __init__(self, batch_size=64, num_topics=4, reg=0.1,
                 numItermax=1000, stopThr=1e-9, block_docs=64):
        self.batch_size = batch_size      # kept for parity (unused in forward)
        self.num_topics = num_topics
        self.reg = reg
        self.numItermax = numItermax
        self.stopThr = stopThr
        self.block_docs = block_docs      # docs per grid step (rounded up to 8)

    # --- batched entry point: B documents, each with its own lbd -------------
    def sinkloss_batch(self, A, M, b, LBD, reg):
        """A: (B, N) documents (rows).  LBD: (B, K) per-doc barycenter weights.
        M: (N, N) ground cost.  b: (N, K) topic distributions.  Returns (B,) losses."""
        A = jnp.asarray(A, jnp.float32)
        M = jnp.asarray(M, jnp.float32)
        b = jnp.asarray(b, jnp.float32)
        LBD = jnp.asarray(LBD, jnp.float32)

        B, N = A.shape
        K = b.shape[1]

        # one-time (amortized) cost kernel and its transpose, outside the hot loop
        C = jnp.exp(-M / jnp.float32(reg))                    # (N, N)
        Ct = jnp.transpose(C)
        b_t = jnp.transpose(b)                                # (K, N)

        # document tile size (sublane-aligned) and padding
        Bt = min(_round_up(int(self.block_docs), 8), _round_up(B, 8))
        B_pad = _round_up(B, Bt)
        n_tiles = B_pad // Bt
        pad = B_pad - B
        if pad:
            A = jnp.concatenate(
                [A, jnp.full((pad, N), 1.0 / N, jnp.float32)], axis=0)
            LBD = jnp.concatenate(
                [LBD, jnp.full((pad, K), 1.0 / K, jnp.float32)], axis=0)
        valid = (jnp.arange(B_pad) < B).astype(jnp.float32).reshape(B_pad, 1)

        # topic distributions replicated per doc slot: row k*Bt + j -> b[:, k]
        b_big = jnp.broadcast_to(b_t[:, None, :], (K, Bt, N)).reshape(K * Bt, N)
        # per-doc weights in the same (topic-major within tile) row order
        lbd_big = jnp.transpose(LBD.reshape(n_tiles, Bt, K), (0, 2, 1)).reshape(
            n_tiles * K * Bt, 1)

        kernel = functools.partial(_sinkloss_kernel, K=K, Bt=Bt,
                                   numItermax=int(self.numItermax),
                                   stopThr=float(self.stopThr))

        cost = pl.CostEstimate(
            flops=int(4 * n_tiles * self.numItermax * K * Bt * N * N),
            transcendentals=int(n_tiles * self.numItermax * (K * Bt * N + Bt * N)
                                + N * N),
            bytes_accessed=int(4 * (B_pad * N + B_pad + 2 * N * N
                                    + K * Bt * N + n_tiles * K * Bt + B_pad)),
        )

        losses = pl.pallas_call(
            kernel,
            out_shape=jax.ShapeDtypeStruct((B_pad, 1), jnp.float32),
            grid_spec=pltpu.PrefetchScalarGridSpec(
                num_scalar_prefetch=0,
                grid=(n_tiles,),
                in_specs=[
                    pl.BlockSpec((Bt, N), lambda i: (i, 0)),          # A tile
                    pl.BlockSpec((Bt, 1), lambda i: (i, 0)),          # valid tile
                    pl.BlockSpec((N, N), lambda i: (0, 0)),           # C
                    pl.BlockSpec((N, N), lambda i: (0, 0)),           # C^T
                    pl.BlockSpec((K * Bt, N), lambda i: (0, 0)),      # b (replicated)
                    pl.BlockSpec((K * Bt, 1), lambda i: (i, 0)),      # per-doc lbd
                ],
                out_specs=pl.BlockSpec((Bt, 1), lambda i: (i, 0)),
                scratch_shapes=[
                    pltpu.VMEM((K * Bt, N), jnp.float32),   # u
                    pltpu.VMEM((K * Bt, N), jnp.float32),   # v
                    pltpu.VMEM((Bt, N), jnp.float32),       # yhat
                    pltpu.VMEM((Bt, 1), jnp.float32),       # per-doc active mask
                ]),
            compiler_params=pltpu.CompilerParams(
                dimension_semantics=("parallel",)),
            cost_estimate=cost,
        )(A, valid, C, Ct, b_big, lbd_big)

        return losses[:B, 0]

    # --- original single-document forward (semantics of the torch module) ----
    def forward(self, a, M, b, lbd, reg):
        a_row = jnp.reshape(jnp.asarray(a, jnp.float32), (1, -1))     # (1, N)
        lbd_row = jnp.reshape(jnp.asarray(lbd, jnp.float32), (1, -1))  # (1, K)
        return self.sinkloss_batch(a_row, M, b, lbd_row, reg)[0]

    __call__ = forward


if __name__ == "__main__":
    key = jax.random.PRNGKey(0)
    k_a, k_m, k_b, k_l = jax.random.split(key, 4)

    N = 128          # histogram support size (Nini == Nfin)
    K = 4            # num_topics
    B = 16           # number of documents for the batched path

    # deterministic, valid Sinkhorn inputs (positive distributions, bounded costs)
    A = jax.nn.softmax(jax.random.normal(k_a, (B, N)), axis=-1)       # B docs (rows)
    M = jnp.abs(jax.random.normal(k_m, (N, N)))
    M = 0.5 * (M + M.T)                       # symmetric nonnegative cost, O(1) scale
    M = M / jnp.max(M)
    b = jax.nn.softmax(jax.random.normal(k_b, (N, K)), axis=0)        # K topic dists
    LBD = jax.nn.softmax(jax.random.normal(k_l, (B, K)), axis=-1)     # per-doc weights
    reg = 0.5

    model = WasserIndexGen(batch_size=B, num_topics=K, reg=reg,
                           numItermax=100, stopThr=1e-9, block_docs=8)

    # single-document forward (exact interface of the PyTorch module)
    loss0 = model(A[0].reshape(N, 1), M, b, LBD[0].reshape(K, 1), reg)
    loss0 = jax.block_until_ready(loss0)

    # batched forward: 16 docs, doc-tile of 8 -> grid of 2 ("parallel" for v7x)
    losses = model.sinkloss_batch(A, M, b, LBD, reg)
    losses = jax.block_until_ready(losses)

    assert jnp.isfinite(loss0), f"non-finite single-doc loss: {loss0}"
    assert bool(jnp.all(jnp.isfinite(losses))), f"non-finite batched losses: {losses}"
    assert jnp.allclose(loss0, losses[0], rtol=1e-3, atol=1e-7), \
        f"single-doc vs batched mismatch: {loss0} vs {losses[0]}"
    print("KERNEL_OK")
</pallas_src>

<mosaic_0001>
module attributes {stable_mosaic.version = 11 : i64} {
  func.func @_sinkloss_kernel(%arg0: i32, %arg1: memref<8x128xf32, #tpu.memory_space<vmem>>, %arg2: memref<8x1xf32, #tpu.memory_space<vmem>>, %arg3: memref<128x128xf32, #tpu.memory_space<vmem>>, %arg4: memref<128x128xf32, #tpu.memory_space<vmem>>, %arg5: memref<32x128xf32, #tpu.memory_space<vmem>>, %arg6: memref<32x1xf32, #tpu.memory_space<vmem>>, %arg7: memref<8x1xf32, #tpu.memory_space<vmem>>, %arg8: memref<32x128xf32, #tpu.memory_space<vmem>>, %arg9: memref<32x128xf32, #tpu.memory_space<vmem>>, %arg10: memref<8x128xf32, #tpu.memory_space<vmem>>, %arg11: memref<8x1xf32, #tpu.memory_space<vmem>>) attributes {dimension_semantics = [#tpu.dimension_semantics<parallel>], iteration_bounds = array<i64: 1>, scalar_prefetch = 0 : i64, scratch_operands = 4 : i64, tpu.core_type = #tpu.core_type<tc>, window_params = [{transform_indices = @transform_0, window_bounds = array<i64: 8, 128>}, {transform_indices = @transform_1, window_bounds = array<i64: 8, 1>}, {pipeline_mode = #tpu.pipeline_mode<synchronous>, transform_indices = @transform_2, window_bounds = array<i64: 128, 128>}, {pipeline_mode = #tpu.pipeline_mode<synchronous>, transform_indices = @transform_3, window_bounds = array<i64: 128, 128>}, {pipeline_mode = #tpu.pipeline_mode<synchronous>, transform_indices = @transform_4, window_bounds = array<i64: 32, 128>}, {transform_indices = @transform_5, window_bounds = array<i64: 32, 1>}, {transform_indices = @transform_6, window_bounds = array<i64: 8, 1>}]} {
    %cst = arith.constant 1.000000e+00 : f32
    %0 = vector.broadcast %cst : f32 to vector<32x128xf32>
    %c0 = arith.constant 0 : index
    %c0_0 = arith.constant 0 : index
    %1 = vector.load %arg8[%c0, %c0_0] : memref<32x128xf32, #tpu.memory_space<vmem>>, vector<32x128xf32>
    tpu.vector_store %arg8[%c0, %c0_0], %0 {strides = array<i32>} : memref<32x128xf32, #tpu.memory_space<vmem>>, vector<32x128xf32>,
    %cst_1 = arith.constant 1.000000e+00 : f32
    %2 = vector.broadcast %cst_1 : f32 to vector<32x128xf32>
    %c0_2 = arith.constant 0 : index
    %c0_3 = arith.constant 0 : index
    %3 = vector.load %arg9[%c0_2, %c0_3] : memref<32x128xf32, #tpu.memory_space<vmem>>, vector<32x128xf32>
    tpu.vector_store %arg9[%c0_2, %c0_3], %2 {strides = array<i32>} : memref<32x128xf32, #tpu.memory_space<vmem>>, vector<32x128xf32>,
    %cst_4 = arith.constant 0.000000e+00 : f32
    %4 = vector.broadcast %cst_4 : f32 to vector<8x128xf32>
    %c0_5 = arith.constant 0 : index
    %c0_6 = arith.constant 0 : index
    %5 = vector.load %arg10[%c0_5, %c0_6] : memref<8x128xf32, #tpu.memory_space<vmem>>, vector<8x128xf32>
    tpu.vector_store %arg10[%c0_5, %c0_6], %4 {strides = array<i32>} : memref<8x128xf32, #tpu.memory_space<vmem>>, vector<8x128xf32>,
    %c0_7 = arith.constant 0 : index
    %c0_8 = arith.constant 0 : index
    %6 = vector.load %arg2[%c0_7, %c0_8] : memref<8x1xf32, #tpu.memory_space<vmem>>, vector<8x1xf32>
    %c0_9 = arith.constant 0 : index
    %c0_10 = arith.constant 0 : index
    %7 = vector.load %arg11[%c0_9, %c0_10] : memref<8x1xf32, #tpu.memory_space<vmem>>, vector<8x1xf32>
    tpu.vector_store %arg11[%c0_9, %c0_10], %6 {strides = array<i32>} : memref<8x1xf32, #tpu.memory_space<vmem>>, vector<8x1xf32>,
    %c0_11 = arith.constant 0 : index
    %c0_12 = arith.constant 0 : index
    %8 = vector.load %arg5[%c0_11, %c0_12] : memref<32x128xf32, #tpu.memory_space<vmem>>, vector<32x128xf32>
    %c0_13 = arith.constant 0 : index
    %c0_14 = arith.constant 0 : index
    %9 = vector.load %arg6[%c0_13, %c0_14] : memref<32x1xf32, #tpu.memory_space<vmem>>, vector<32x1xf32>
    %c0_15 = arith.constant 0 : index
    %c0_16 = arith.constant 0 : index
    %10 = vector.load %arg11[%c0_15, %c0_16] : memref<8x1xf32, #tpu.memory_space<vmem>>, vector<8x1xf32>
    %11 = vector.shape_cast %10 : vector<8x1xf32> to vector<1x8x1xf32>
    %cst_17 = arith.constant dense<0xFF800000> : vector<1xf32>
    %12 = vector.multi_reduction <maximumf>, %11, %cst_17 [1, 2] : vector<1x8x1xf32> to vector<1xf32>
    %13 = vector.shape_cast %12 : vector<1xf32> to vector<1x1x1xf32>
    %14 = vector.extract %13[0, 0, 0] : f32 from vector<1x1x1xf32>
    %cst_18 = arith.constant 0.000000e+00 : f32
    %15 = arith.cmpf ogt, %14, %cst_18 : f32
    %16 = arith.extui %15 : i1 to i32
    %c0_i32 = arith.constant 0 : i32
    %17:2 = scf.while (%arg12 = %c0_i32, %arg13 = %16) : (i32, i32) -> (i32, i32) {
      %c100_i32 = arith.constant 100 : i32
      %25 = arith.cmpi slt, %arg12, %c100_i32 : i32
      %c0_i32_26 = arith.constant 0 : i32
      %26 = arith.cmpi sgt, %arg13, %c0_i32_26 : i32
      %27 = arith.andi %25, %26 : i1
      scf.condition(%27) %arg12, %arg13 : i32, i32
    } do {
    ^bb0(%arg12: i32, %arg13: i32):
      %c0_26 = arith.constant 0 : index
      %c0_27 = arith.constant 0 : index
      %25 = vector.load %arg11[%c0_26, %c0_27] : memref<8x1xf32, #tpu.memory_space<vmem>>, vector<8x1xf32>
      %cst_28 = arith.constant 0.000000e+00 : f32
      %26 = vector.broadcast %cst_28 : f32 to vector<8x1xf32>
      %27 = arith.cmpf ogt, %25, %26 : vector<8x1xf32>
      %c0_29 = arith.constant 0 : index
      %c0_30 = arith.constant 0 : index
      %28 = vector.load %arg8[%c0_29, %c0_30] : memref<32x128xf32, #tpu.memory_space<vmem>>, vector<32x128xf32>
      %c0_31 = arith.constant 0 : index
      %c0_32 = arith.constant 0 : index
      %29 = vector.load %arg9[%c0_31, %c0_32] : memref<32x128xf32, #tpu.memory_space<vmem>>, vector<32x128xf32>
      %c0_33 = arith.constant 0 : index
      %c0_34 = arith.constant 0 : index
      %30 = vector.load %arg4[%c0_33, %c0_34] : memref<128x128xf32, #tpu.memory_space<vmem>>, vector<128x128xf32>
      %cst_35 = arith.constant dense<0.000000e+00> : vector<32x128xf32>
      %31 = tpu.matmul %28, %30, %cst_35 {dimension_numbers = #tpu.dot_dimension_numbers<[1], [0], [0], [1], [0, 0, 1, 1], [], []>} : vector<32x128xf32>, vector<128x128xf32>, vector<32x128xf32> -> vector<32x128xf32>
      %32 = arith.divf %8, %31 : vector<32x128xf32>
      %c0_36 = arith.constant 0 : index
      %c0_37 = arith.constant 0 : index
      %33 = vector.load %arg3[%c0_36, %c0_37] : memref<128x128xf32, #tpu.memory_space<vmem>>, vector<128x128xf32>
      %cst_38 = arith.constant dense<0.000000e+00> : vector<32x128xf32>
      %34 = tpu.matmul %32, %33, %cst_38 {dimension_numbers = #tpu.dot_dimension_numbers<[1], [0], [0], [1], [0, 0, 1, 1], [], []>} : vector<32x128xf32>, vector<128x128xf32>, vector<32x128xf32> -> vector<32x128xf32>
      %35 = math.log %34 : vector<32x128xf32>
      %36 = vector.broadcast %9 : vector<32x1xf32> to vector<32x128xf32>
      %37 = arith.mulf %36, %35 : vector<32x128xf32>
      %38 = vector.extract_strided_slice %37 {offsets = [0, 0], sizes = [8, 128], strides = [1, 1]} : vector<32x128xf32> to vector<8x128xf32>
      %39 = vector.extract_strided_slice %37 {offsets = [8, 0], sizes = [8, 128], strides = [1, 1]} : vector<32x128xf32> to vector<8x128xf32>
      %40 = arith.addf %38, %39 : vector<8x128xf32>
      %41 = vector.extract_strided_slice %37 {offsets = [16, 0], sizes = [8, 128], strides = [1, 1]} : vector<32x128xf32> to vector<8x128xf32>
      %42 = arith.addf %40, %41 : vector<8x128xf32>
      %43 = vector.extract_strided_slice %37 {offsets = [24, 0], sizes = [8, 128], strides = [1, 1]} : vector<32x128xf32> to vector<8x128xf32>
      %44 = arith.addf %42, %43 : vector<8x128xf32>
      %45 = math.exp %44 : vector<8x128xf32>
      %46 = tpu.concatenate %45, %45, %45, %45 in 0 : vector<8x128xf32>, vector<8x128xf32>, vector<8x128xf32>, vector<8x128xf32> -> vector<32x128xf32>
      %47 = arith.divf %46, %34 : vector<32x128xf32>
      %cst_39 = arith.constant 0.000000e+00 : f32
      %48 = vector.broadcast %cst_39 : f32 to vector<32x128xf32>
      %49 = arith.cmpf oeq, %31, %48 : vector<32x128xf32>
      %50 = arith.cmpf one, %47, %47 : vector<32x128xf32>
      %51 = arith.ori %49, %50 : vector<32x128xi1>
      %52 = math.absf %47 : vector<32x128xf32>
      %cst_40 = arith.constant 0x7F800000 : f32
      %53 = vector.broadcast %cst_40 : f32 to vector<32x128xf32>
      %54 = arith.cmpf oeq, %52, %53 : vector<32x128xf32>
      %55 = arith.ori %51, %54 : vector<32x128xi1>
      %56 = arith.extui %55 : vector<32x128xi1> to vector<32x128xi32>
      %57 = arith.sitofp %56 : vector<32x128xi32> to vector<32x128xf32>
      %cst_41 = arith.constant dense<0xFF800000> : vector<32xf32>
      %58 = vector.multi_reduction <maximumf>, %57, %cst_41 [1] : vector<32x128xf32> to vector<32xf32>
      %59 = vector.shape_cast %58 : vector<32xf32> to vector<32x1xf32>
      %60 = vector.extract_strided_slice %59 {offsets = [0, 0], sizes = [8, 1], strides = [1, 1]} : vector<32x1xf32> to vector<8x1xf32>
      %61 = vector.extract_strided_slice %59 {offsets = [8, 0], sizes = [8, 1], strides = [1, 1]} : vector<32x1xf32> to vector<8x1xf32>
      %62 = arith.addf %60, %61 : vector<8x1xf32>
      %63 = vector.extract_strided_slice %59 {offsets = [16, 0], sizes = [8, 1], strides = [1, 1]} : vector<32x1xf32> to vector<8x1xf32>
      %64 = arith.addf %62, %63 : vector<8x1xf32>
      %65 = vector.extract_strided_slice %59 {offsets = [24, 0], sizes = [8, 1], strides = [1, 1]} : vector<32x1xf32> to vector<8x1xf32>
      %66 = arith.addf %64, %65 : vector<8x1xf32>
      %cst_42 = arith.constant 0.000000e+00 : f32
      %67 = vector.broadcast %cst_42 : f32 to vector<8x1xf32>
      %68 = arith.cmpf ogt, %66, %67 : vector<8x1xf32>
      %cst_43 = arith.constant dense<true> : vector<8x1xi1>
      %69 = arith.xori %68, %cst_43 : vector<8x1xi1>
      %70 = arith.andi %27, %69 : vector<8x1xi1>
      %71 = arith.extui %70 : vector<8x1xi1> to vector<8x1xi32>
      %72 = arith.sitofp %71 : vector<8x1xi32> to vector<8x1xf32>
      %73 = tpu.concatenate %72, %72, %72, %72 in 0 : vector<8x1xf32>, vector<8x1xf32>, vector<8x1xf32>, vector<8x1xf32> -> vector<32x1xf32>
      %cst_44 = arith.constant 0.000000e+00 : f32
      %74 = vector.broadcast %cst_44 : f32 to vector<32x1xf32>
      %75 = arith.cmpf ogt, %73, %74 : vector<32x1xf32>
      %76 = vector.shape_cast %75 : vector<32x1xi1> to vector<32x1xi1>
      %77 = vector.broadcast %76 : vector<32x1xi1> to vector<32x128xi1>
      %78 = arith.select %77, %47, %28 : vector<32x128xi1>, vector<32x128xf32>
      %c0_45 = arith.constant 0 : index
      %c0_46 = arith.constant 0 : index
      %79 = vector.load %arg8[%c0_45, %c0_46] : memref<32x128xf32, #tpu.memory_space<vmem>>, vector<32x128xf32>
      tpu.vector_store %arg8[%c0_45, %c0_46], %78 {strides = array<i32>} : memref<32x128xf32, #tpu.memory_space<vmem>>, vector<32x128xf32>,
      %80 = vector.shape_cast %75 : vector<32x1xi1> to vector<32x1xi1>
      %81 = vector.broadcast %80 : vector<32x1xi1> to vector<32x128xi1>
      %82 = arith.select %81, %34, %29 : vector<32x128xi1>, vector<32x128xf32>
      %c0_47 = arith.constant 0 : index
      %c0_48 = arith.constant 0 : index
      %83 = vector.load %arg9[%c0_47, %c0_48] : memref<32x128xf32, #tpu.memory_space<vmem>>, vector<32x128xf32>
      tpu.vector_store %arg9[%c0_47, %c0_48], %82 {strides = array<i32>} : memref<32x128xf32, #tpu.memory_space<vmem>>, vector<32x128xf32>,
      %c0_49 = arith.constant 0 : index
      %c0_50 = arith.constant 0 : index
      %84 = vector.load %arg10[%c0_49, %c0_50] : memref<8x128xf32, #tpu.memory_space<vmem>>, vector<8x128xf32>
      %85 = vector.shape_cast %70 : vector<8x1xi1> to vector<8x1xi1>
      %86 = vector.broadcast %85 : vector<8x1xi1> to vector<8x128xi1>
      %87 = arith.select %86, %45, %84 : vector<8x128xi1>, vector<8x128xf32>
      %c0_51 = arith.constant 0 : index
      %c0_52 = arith.constant 0 : index
      %88 = vector.load %arg10[%c0_51, %c0_52] : memref<8x128xf32, #tpu.memory_space<vmem>>, vector<8x128xf32>
      tpu.vector_store %arg10[%c0_51, %c0_52], %87 {strides = array<i32>} : memref<8x128xf32, #tpu.memory_space<vmem>>, vector<8x128xf32>,
      %c0_53 = arith.constant 0 : index
      %c0_54 = arith.constant 0 : index
      %89 = vector.load %arg11[%c0_53, %c0_54] : memref<8x1xf32, #tpu.memory_space<vmem>>, vector<8x1xf32>
      tpu.vector_store %arg11[%c0_53, %c0_54], %72 {strides = array<i32>} : memref<8x1xf32, #tpu.memory_space<vmem>>, vector<8x1xf32>,
      %c10_i32 = arith.constant 10 : i32
      %c0_i32_55 = arith.constant 0 : i32
      %90 = arith.cmpi eq, %c10_i32, %c0_i32_55 : i32
      %c1_i32 = arith.constant 1 : i32
      %91 = arith.select %90, %c1_i32, %c10_i32 : i32
      %92 = arith.remsi %arg12, %91 : i32
      %c0_i32_56 = arith.constant 0 : i32
      %93 = arith.cmpi ne, %92, %c0_i32_56 : i32
      %c0_i32_57 = arith.constant 0 : i32
      %94 = arith.cmpi slt, %92, %c0_i32_57 : i32
      %c0_i32_58 = arith.constant 0 : i32
      %95 = arith.cmpi slt, %91, %c0_i32_58 : i32
      %96 = arith.xori %94, %95 : i1
      %97 = arith.andi %96, %93 : i1
      %98 = arith.addi %92, %91 : i32
      %99 = arith.select %97, %98, %92 : i32
      %c0_i32_59 = arith.constant 0 : i32
      %100 = arith.cmpi eq, %99, %c0_i32_59 : i32
      %101 = arith.extui %100 : i1 to i32
      %c0_i32_60 = arith.constant 0 : i32
      %102 = arith.cmpi ne, %101, %c0_i32_60 : i32
      scf.if %102 {
        %111 = arith.subf %47, %28 : vector<32x128xf32>
        %112 = arith.subf %34, %29 : vector<32x128xf32>
        %113 = arith.mulf %111, %111 : vector<32x128xf32>
        %cst_66 = arith.constant dense<0.000000e+00> : vector<32xf32>
        %114 = vector.multi_reduction <add>, %113, %cst_66 [1] : vector<32x128xf32> to vector<32xf32>
        %115 = vector.shape_cast %114 : vector<32xf32> to vector<32x1xf32>
        %116 = vector.extract_strided_slice %115 {offsets = [0, 0], sizes = [8, 1], strides = [1, 1]} : vector<32x1xf32> to vector<8x1xf32>
        %117 = vector.extract_strided_slice %115 {offsets = [8, 0], sizes = [8, 1], strides = [1, 1]} : vector<32x1xf32> to vector<8x1xf32>
        %118 = arith.addf %116, %117 : vector<8x1xf32>
        %119 = vector.extract_strided_slice %115 {offsets = [16, 0], sizes = [8, 1], strides = [1, 1]} : vector<32x1xf32> to vector<8x1xf32>
        %120 = arith.addf %118, %119 : vector<8x1xf32>
        %121 = vector.extract_strided_slice %115 {offsets = [24, 0], sizes = [8, 1], strides = [1, 1]} : vector<32x1xf32> to vector<8x1xf32>
        %122 = arith.addf %120, %121 : vector<8x1xf32>
        %123 = arith.mulf %47, %47 : vector<32x128xf32>
        %cst_67 = arith.constant dense<0.000000e+00> : vector<32xf32>
        %124 = vector.multi_reduction <add>, %123, %cst_67 [1] : vector<32x128xf32> to vector<32xf32>
        %125 = vector.shape_cast %124 : vector<32xf32> to vector<32x1xf32>
        %126 = vector.extract_strided_slice %125 {offsets = [0, 0], sizes = [8, 1], strides = [1, 1]} : vector<32x1xf32> to vector<8x1xf32>
        %127 = vector.extract_strided_slice %125 {offsets = [8, 0], sizes = [8, 1], strides = [1, 1]} : vector<32x1xf32> to vector<8x1xf32>
        %128 = arith.addf %126, %127 : vector<8x1xf32>
        %129 = vector.extract_strided_slice %125 {offsets = [16, 0], sizes = [8, 1], strides = [1, 1]} : vector<32x1xf32> to vector<8x1xf32>
        %130 = arith.addf %128, %129 : vector<8x1xf32>
        %131 = vector.extract_strided_slice %125 {offsets = [24, 0], sizes = [8, 1], strides = [1, 1]} : vector<32x1xf32> to vector<8x1xf32>
        %132 = arith.addf %130, %131 : vector<8x1xf32>
        %133 = arith.divf %122, %132 : vector<8x1xf32>
        %134 = arith.mulf %112, %112 : vector<32x128xf32>
        %cst_68 = arith.constant dense<0.000000e+00> : vector<32xf32>
        %135 = vector.multi_reduction <add>, %134, %cst_68 [1] : vector<32x128xf32> to vector<32xf32>
        %136 = vector.shape_cast %135 : vector<32xf32> to vector<32x1xf32>
        %137 = vector.extract_strided_slice %136 {offsets = [0, 0], sizes = [8, 1], strides = [1, 1]} : vector<32x1xf32> to vector<8x1xf32>
        %138 = vector.extract_strided_slice %136 {offsets = [8, 0], sizes = [8, 1], strides = [1, 1]} : vector<32x1xf32> to vector<8x1xf32>
        %139 = arith.addf %137, %138 : vector<8x1xf32>
        %140 = vector.extract_strided_slice %136 {offsets = [16, 0], sizes = [8, 1], strides = [1, 1]} : vector<32x1xf32> to vector<8x1xf32>
        %141 = arith.addf %139, %140 : vector<8x1xf32>
        %142 = vector.extract_strided_slice %136 {offsets = [24, 0], sizes = [8, 1], strides = [1, 1]} : vector<32x1xf32> to vector<8x1xf32>
        %143 = arith.addf %141, %142 : vector<8x1xf32>
        %144 = arith.mulf %34, %34 : vector<32x128xf32>
        %cst_69 = arith.constant dense<0.000000e+00> : vector<32xf32>
        %145 = vector.multi_reduction <add>, %144, %cst_69 [1] : vector<32x128xf32> to vector<32xf32>
        %146 = vector.shape_cast %145 : vector<32xf32> to vector<32x1xf32>
        %147 = vector.extract_strided_slice %146 {offsets = [0, 0], sizes = [8, 1], strides = [1, 1]} : vector<32x1xf32> to vector<8x1xf32>
        %148 = vector.extract_strided_slice %146 {offsets = [8, 0], sizes = [8, 1], strides = [1, 1]} : vector<32x1xf32> to vector<8x1xf32>
        %149 = arith.addf %147, %148 : vector<8x1xf32>
        %150 = vector.extract_strided_slice %146 {offsets = [16, 0], sizes = [8, 1], strides = [1, 1]} : vector<32x1xf32> to vector<8x1xf32>
        %151 = arith.addf %149, %150 : vector<8x1xf32>
        %152 = vector.extract_strided_slice %146 {offsets = [24, 0], sizes = [8, 1], strides = [1, 1]} : vector<32x1xf32> to vector<8x1xf32>
        %153 = arith.addf %151, %152 : vector<8x1xf32>
        %154 = arith.divf %143, %153 : vector<8x1xf32>
        %155 = arith.addf %133, %154 : vector<8x1xf32>
        %cst_70 = arith.constant 9.99999971E-10 : f32
        %156 = vector.broadcast %cst_70 : f32 to vector<8x1xf32>
        %157 = arith.cmpf ogt, %155, %156 : vector<8x1xf32>
        %158 = arith.andi %70, %157 : vector<8x1xi1>
        %159 = arith.extui %158 : vector<8x1xi1> to vector<8x1xi32>
        %160 = arith.sitofp %159 : vector<8x1xi32> to vector<8x1xf32>
        %c0_71 = arith.constant 0 : index
        %c0_72 = arith.constant 0 : index
        %161 = vector.load %arg11[%c0_71, %c0_72] : memref<8x1xf32, #tpu.memory_space<vmem>>, vector<8x1xf32>
        tpu.vector_store %arg11[%c0_71, %c0_72], %160 {strides = array<i32>} : memref<8x1xf32, #tpu.memory_space<vmem>>, vector<8x1xf32>,
      } else {
      }
      %c0_61 = arith.constant 0 : index
      %c0_62 = arith.constant 0 : index
      %103 = vector.load %arg11[%c0_61, %c0_62] : memref<8x1xf32, #tpu.memory_space<vmem>>, vector<8x1xf32>
      %104 = vector.shape_cast %103 : vector<8x1xf32> to vector<1x8x1xf32>
      %cst_63 = arith.constant dense<0xFF800000> : vector<1xf32>
      %105 = vector.multi_reduction <maximumf>, %104, %cst_63 [1, 2] : vector<1x8x1xf32> to vector<1xf32>
      %106 = vector.shape_cast %105 : vector<1xf32> to vector<1x1x1xf32>
      %107 = vector.extract %106[0, 0, 0] : f32 from vector<1x1x1xf32>
      %cst_64 = arith.constant 0.000000e+00 : f32
      %108 = arith.cmpf ogt, %107, %cst_64 : f32
      %109 = arith.extui %108 : i1 to i32
      %c1_i32_65 = arith.constant 1 : i32
      %110 = arith.addi %arg12, %c1_i32_65 : i32
      scf.yield %110, %109 : i32, i32
    }
    %c0_19 = arith.constant 0 : index
    %c0_20 = arith.constant 0 : index
    %18 = vector.load %arg10[%c0_19, %c0_20] : memref<8x128xf32, #tpu.memory_space<vmem>>, vector<8x128xf32>
    %c0_21 = arith.constant 0 : index
    %c0_22 = arith.constant 0 : index
    %19 = vector.load %arg1[%c0_21, %c0_22] : memref<8x128xf32, #tpu.memory_space<vmem>>, vector<8x128xf32>
    %20 = arith.subf %18, %19 : vector<8x128xf32>
    %21 = arith.mulf %20, %20 : vector<8x128xf32>
    %cst_23 = arith.constant dense<0.000000e+00> : vector<8xf32>
    %22 = vector.multi_reduction <add>, %21, %cst_23 [1] : vector<8x128xf32> to vector<8xf32>
    %23 = vector.shape_cast %22 : vector<8xf32> to vector<8x1xf32>
    %c0_24 = arith.constant 0 : index
    %c0_25 = arith.constant 0 : index
    %24 = vector.load %arg7[%c0_24, %c0_25] : memref<8x1xf32, #tpu.memory_space<vmem>>, vector<8x1xf32>
    tpu.vector_store %arg7[%c0_24, %c0_25], %23 {strides = array<i32>} : memref<8x1xf32, #tpu.memory_space<vmem>>, vector<8x1xf32>,
    return
  }
  func.func @transform_0(%arg0: i32) -> (i32, i32) {
    %c0_i32 = arith.constant 0 : i32
    %c0_i32_0 = arith.constant 0 : i32
    return %arg0, %c0_i32 : i32, i32
  }
  func.func @transform_1(%arg0: i32) -> (i32, i32) {
    %c0_i32 = arith.constant 0 : i32
    %c0_i32_0 = arith.constant 0 : i32
    return %arg0, %c0_i32 : i32, i32
  }
  func.func @transform_2(%arg0: i32) -> (i32, i32) {
    %c0_i32 = arith.constant 0 : i32
    %c0_i32_0 = arith.constant 0 : i32
    %c0_i32_1 = arith.constant 0 : i32
    return %c0_i32, %c0_i32_0 : i32, i32
  }
  func.func @transform_3(%arg0: i32) -> (i32, i32) {
    %c0_i32 = arith.constant 0 : i32
    %c0_i32_0 = arith.constant 0 : i32
    %c0_i32_1 = arith.constant 0 : i32
    return %c0_i32, %c0_i32_0 : i32, i32
  }
  func.func @transform_4(%arg0: i32) -> (i32, i32) {
    %c0_i32 = arith.constant 0 : i32
    %c0_i32_0 = arith.constant 0 : i32
    %c0_i32_1 = arith.constant 0 : i32
    return %c0_i32, %c0_i32_0 : i32, i32
  }
  func.func @transform_5(%arg0: i32) -> (i32, i32) {
    %c0_i32 = arith.constant 0 : i32
    %c0_i32_0 = arith.constant 0 : i32
    return %arg0, %c0_i32 : i32, i32
  }
  func.func @transform_6(%arg0: i32) -> (i32, i32) {
    %c0_i32 = arith.constant 0 : i32
    %c0_i32_0 = arith.constant 0 : i32
    return %arg0, %c0_i32 : i32, i32
  }
}

</mosaic_0001>

<bundles_post_ra>
// kernel: tpu_custom_call.1
= control target key start
LH: loop header
LB: loop body
LE: loop exit
PB: predicated region body
PF: predicated region fallthrough
CT: control target
= control target key end

     0   :  { %11 = vsyncpa [#allocation7], 0  ;;  %s1144_s0 = inlined_call_operand.vmem [shape: f32[8,128], index: 0, kind: input, shape index: {}]   ;;  %s1145_s1 = inlined_call_operand.vmem [shape: f32[8,1], index: 1, kind: input, shape index: {}]   ;;  %s1146_s2 = inlined_call_operand.hbm [shape: f32[128,128], index: 2, kind: input, shape index: {}]   ;;  %s1147_s3 = inlined_call_operand.hbm [shape: f32[128,128], index: 3, kind: input, shape index: {}]   ;;  %s1148_s4 = inlined_call_operand.vmem [shape: f32[32,128], index: 4, kind: input, shape index: {}]   ;;  %s1149_s5 = inlined_call_operand.vmem [shape: f32[32,1], index: 5, kind: input, shape index: {}]   ;;  %s1150_s6 = inlined_call_operand.vmem [shape: f32[8,1], index: 6, kind: output, shape index: {}]  }
   0x1   :  { %12 = vsyncpa [#allocation9], 0  ;;  %s870_s21 = smov [#allocation6]   ;;  %s814_s25 = scalar_lea.hbm %s1146_s2, 2048 }
   0x2   :  { %s22_s22 = sshll.u32 %s870_s21, 4  ;;  %p815_p0 = scmp.ne.s32.totalorder %s1146_s2, %s814_s25  ;;  %s23_s22 = int_to_ptr.vmem [resolvable:$true] %s22_s22 }
   0x3   :  { %p818_p1 = scmp.lt.u32.totalorder %s814_s25, %s1146_s2 }
   0x5   :  { %p820_p2 = pnand %p818_p1, %p815_p0 }
   0x7   :  { %823 = shalt.err (!%p820_p2)
}
   0x8   :  { %s824_s30 = scalar_lea.vmem %s23_s22, 2048  ;;  %p829_p4 = scmp.lt.s32.totalorder %s23_s22, %s23_s22 }
   0x9   :  { %p825_p3 = scmp.ne.s32.totalorder %s23_s22, %s824_s30  ;;  %p830_p5 = scmp.lt.s32.totalorder %s824_s30, %s824_s30 }
   0xb   :  { %p831_p6 = por %p830_p5, %p829_p4 }
   0xd   :  { %p832_p7 = pnand %p831_p6, %p825_p3 }
   0xf   :  { %835 = shalt.err (!%p832_p7)
}
  0x10   :  { %s871_s7 = smov 128   ;;  %s872_s8 = smov 8  }
  0x11   :  { %28 = dma.hbm_to_vmem [thread:$0]  %s1146_s2, 2048, %s23_s22, [#allocation7], %s871_s7, %s871_s7, %s872_s8  }
  0x12   :  { %s873_s11 = smov [#allocation8]   ;;  %s836_s15 = scalar_lea.hbm %s1147_s3, 2048 }
  0x13   :  { %s34_s12 = sshll.u32 %s873_s11, 4  ;;  %p837_p8 = scmp.ne.s32.totalorder %s1147_s3, %s836_s15  ;;  %s35_s12 = int_to_ptr.vmem [resolvable:$true] %s34_s12 }
  0x14   :  { %p840_p9 = scmp.lt.u32.totalorder %s836_s15, %s1147_s3 }
  0x16   :  { %p842_p10 = pnand %p840_p9, %p837_p8 }
  0x18   :  { %845 = shalt.err (!%p842_p10)
}
  0x19   :  { %s846_s20 = scalar_lea.vmem %s35_s12, 2048  ;;  %p851_p12 = scmp.lt.s32.totalorder %s35_s12, %s35_s12 }
  0x1a   :  { %p847_p11 = scmp.ne.s32.totalorder %s35_s12, %s846_s20  ;;  %p852_p13 = scmp.lt.s32.totalorder %s846_s20, %s846_s20 }
  0x1c   :  { %p853_p0 = por %p852_p13, %p851_p12 }
  0x1e   :  { %p854_p1 = pnand %p853_p0, %p847_p11 }
  0x20   :  { %857 = shalt.err (!%p854_p1)
}
  0x21   :  { %40 = dma.hbm_to_vmem [thread:$0]  %s1147_s3, 2048, %s35_s12, [#allocation9], %s871_s7, %s871_s7, %s872_s8  }
  0x22   :  { %862 = dma.done.wait [#allocation7], 2048  }
  0x23   :  { %863 = vsyncadd [#allocation7], 4294965248 }
  0x24   :  { %864 = dma.done.wait [#allocation9], 2048  }
  0x25   :  { %865 = vsyncadd [#allocation9], 4294965248  ;;  %v874_v0 = vmov 1.0   ;;  %v875_v1 = vmov 0.0   ;;  %v942_v2 = vld [vmem:[%s1148_s4] sm:$0xff]  ;;  %v947_v3 = vld [vmem:[%s1148_s4 + $0x8] sm:$0xff] }
  0x26   :  { %51 = vst [vmem:[#allocation2] sm:$0xff] %v874_v0  ;;  %52 = vst [vmem:[#allocation2 + $0x8] sm:$0xff] %v874_v0  ;;  %v952_v4 = vld [vmem:[%s1148_s4 + $0x10] sm:$0xff]  ;;  %vm61_vm0 = vcmask 7168   ;;  %v957_v5 = vld [vmem:[%s1148_s4 + $0x18] sm:$0xff] }
  0x27   :  { %53 = vst [vmem:[#allocation2 + $0x10] sm:$0xff] %v874_v0  ;;  %54 = vst [vmem:[#allocation2 + $0x18] sm:$0xff] %v874_v0  ;;  %v962_v6 = vld [vmem:[%s1149_s5] sm:$0xff]  ;;  %v967_v7 = vld [vmem:[%s1149_s5 + $0x8] sm:$0xff] }
  0x28   :  { %55 = vst [vmem:[#allocation3] sm:$0xff] %v874_v0  ;;  %56 = vst [vmem:[#allocation3 + $0x8] sm:$0xff] %v874_v0  ;;  %v972_v8 = vld [vmem:[%s1149_s5 + $0x10] sm:$0xff]  ;;  %v977_v9 = vld [vmem:[%s1149_s5 + $0x18] sm:$0xff] }
  0x29   :  { %57 = vst [vmem:[#allocation3 + $0x10] sm:$0xff] %v874_v0  ;;  %58 = vst [vmem:[#allocation3 + $0x18] sm:$0xff] %v874_v0  ;;  %v60_v10 = vld [vmem:[%s1145_s1] sm:$0xff] }
  0x2a   :  { %59 = vst [vmem:[#allocation4] sm:$0xff] %v875_v1  ;;  %62 = vst.msk [vmem:[#allocation5] sm:$0xff] %vm61_vm0, %v60_v10 }
  0x31   :  { %v71_v11 = vld [vmem:[#allocation5] sm:$0xff] }
  0x32   :  { %v72_v12 = vsel %vm61_vm0, %v71_v11, -inf }
  0x33   :  { %73 = vmax.xlane.f32.xlu0 %v72_v12 }
  0xc0   :  { %v74_v13 = vpop.xlane.xlu0 %73 }
  0xc1   :  { %v75_v14 = vrot.slane %v74_v13, 4 }
  0xc3   :  { %v76_v15 = vmax.f32 %v74_v13, %v75_v14 }
  0xc5   :  { %v77_v16 = vrot.slane %v76_v15, 2 }
  0xc7   :  { %v78_v17 = vmax.f32 %v76_v15, %v77_v16 }
  0xc9   :  { %v79_v18 = vrot.slane %v78_v17, 1 }
  0xcb   :  { %v80_v19 = vmax.f32 %v78_v17, %v79_v18 }
  0xcd   :  { %757 = vpush %v80_v19 }
  0xfe   :  { %s758_s5 = spop %757 }
  0xff   :  { %p82_p2 = scmp.gt.f32.partialorder %s758_s5, 0.0 }
 0x100   :  { %s984_s14 = smov (%p82_p2), 0  }
 0x101   :  { %563 = sbr.rel (!%p82_p2) target bundleno = 1465 (0x5b9), region = 57 }
 0x108 LB: > { %v103_v20 = vld [vmem:[#allocation8] sm:$0xff]  ;;  %v104_v21 = vld [vmem:[#allocation8 + $0x8] sm:$0xff]  ;;  %v105_v22 = vld [vmem:[#allocation8 + $0x10] sm:$0xff]  ;;  %v876_v16 = vmov 0   ;;  %s437_s1 = ssub.s32 0, %s868_s14  ;;  %p436_p3 = scmp.lt.s32.totalorder %s868_s14, 0  ;;  %s868_s14 = sphi %s984_s14, %s544_s14  }
 0x109   : > { %v693_v23 = vpack.c.bf16 %v104_v21, %v103_v20  ;;  %v106_v24 = vld [vmem:[#allocation8 + $0x18] sm:$0xff]  ;;  %v107_v26 = vld [vmem:[#allocation8 + $0x20] sm:$0xff]  ;;  %v108_v27 = vld [vmem:[#allocation8 + $0x28] sm:$0xff]  ;;  %780 = vset.pattern.permute.xlu0 %v876_v16  ;;  %781 = vset.pattern.permute.xlu1 %v876_v16  ;;  %s572_s15 = smin.u32 %s868_s14, %s437_s1 }
 0x10a   : > { %v697_v25 = vpack.c.bf16 %v106_v24, %v105_v22  ;;  %v701_v28 = vpack.c.bf16 %v108_v27, %v107_v26  ;;  %v989_v29 = vld [vmem:[#allocation2] sm:$0xff]  ;;  %v110_v31 = vld [vmem:[#allocation8 + $0x38] sm:$0xff]  ;;  %v212_v32 = vld [vmem:[#allocation6] sm:$0xff]  ;;  %323 = vperm.xlu0 %780, %v962_v6   ;;  %333 = vperm.xlu1 %781, %v972_v8   ;;  %782 = sdivrem.u32 %s572_s15, 10 }
 0x10b   : > { %694 = vmatprep.subr.bf16.mxu0 %v693_v23  ;;  %v109_v30 = vld [vmem:[#allocation8 + $0x30] sm:$0xff]  ;;  %649 = vmatprep.mubr.f32.mxu0 %v989_v29  ;;  %v213_v33 = vld [vmem:[#allocation6 + $0x8] sm:$0xff]  ;;  %v215_v35 = vld [vmem:[#allocation6 + $0x18] sm:$0xff] }
 0x10c   : > { %696 = vmatpush3.bf16.msra.mxu0 %v693_v23  ;;  %v214_v34 = vld [vmem:[#allocation6 + $0x10] sm:$0xff]  ;;  %v725_v36 = vpack.c.bf16 %v213_v33, %v212_v32  ;;  %v705_v38 = vpack.c.bf16 %v110_v31, %v109_v30  ;;  %v216_v39 = vld [vmem:[#allocation6 + $0x20] sm:$0xff]  ;;  %v217_v40 = vld [vmem:[#allocation6 + $0x28] sm:$0xff] }
 0x10d   : > { %698 = vmatprep.subr.bf16.mxu0 %v697_v25  ;;  %v729_v37 = vpack.c.bf16 %v215_v35, %v214_v34  ;;  %v111_v41 = vld [vmem:[#allocation8 + $0x40] sm:$0xff]  ;;  %v112_v42 = vld [vmem:[#allocation8 + $0x48] sm:$0xff]  ;;  %v733_v43 = vpack.c.bf16 %v217_v40, %v216_v39  ;;  %v218_v45 = vld [vmem:[#allocation6 + $0x30] sm:$0xff] }
 0x10e   : > { %726 = vmatprep.subr.bf16.mxu1 %v725_v36  ;;  %v709_v44 = vpack.c.bf16 %v112_v42, %v111_v41  ;;  %v219_v46 = vld [vmem:[#allocation6 + $0x38] sm:$0xff]  ;;  %v113_v47 = vld [vmem:[#allocation8 + $0x50] sm:$0xff]  ;;  %v115_v51 = vld [vmem:[#allocation8 + $0x60] sm:$0xff]  ;;  %328 = vperm.xlu0 %780, %v967_v7  }
 0x10f   : > { %728 = vmatpush3.bf16.msra.mxu1 %v725_v36  ;;  %v114_v48 = vld [vmem:[#allocation8 + $0x58] sm:$0xff]  ;;  %v737_v49 = vpack.c.bf16 %v219_v46, %v218_v45  ;;  %v116_v52 = vld [vmem:[#allocation8 + $0x68] sm:$0xff]  ;;  %v117_v54 = vld [vmem:[#allocation8 + $0x70] sm:$0xff]  ;;  %338 = vperm.xlu1 %781, %v977_v9  }
 0x110   : > { %700 = vmatpush3.bf16.msra.mxu0 %v697_v25  ;;  %730 = vmatprep.subr.bf16.mxu1 %v729_v37  ;;  %v713_v50 = vpack.c.bf16 %v114_v48, %v113_v47  ;;  %v717_v53 = vpack.c.bf16 %v116_v52, %v115_v51  ;;  %v118_v55 = vld [vmem:[#allocation8 + $0x78] sm:$0xff]  ;;  %v994_v58 = vld [vmem:[#allocation2 + $0x10] sm:$0xff]  ;;  %v998_v59 = vld [vmem:[#allocation2 + $0x18] sm:$0xff] }
 0x111   : > { %702 = vmatprep.subr.bf16.mxu0 %v701_v28  ;;  %v721_v56 = vpack.c.bf16 %v118_v55, %v117_v54  ;;  %v992_v57 = vld [vmem:[#allocation2 + $0x8] sm:$0xff]  ;;  %v220_v60 = vld [vmem:[#allocation6 + $0x40] sm:$0xff]  ;;  %v221_v61 = vld [vmem:[#allocation6 + $0x48] sm:$0xff] }
 0x112   : > { %v741_v62 = vpack.c.bf16 %v221_v61, %v220_v60  ;;  %v222_v63 = vld [vmem:[#allocation6 + $0x50] sm:$0xff]  ;;  %v223_v0 = vld [vmem:[#allocation6 + $0x58] sm:$0xff]  ;;  %v224_v10 = vld [vmem:[#allocation6 + $0x60] sm:$0xff] }
 0x113   : > { %732 = vmatpush3.bf16.msra.mxu1 %v729_v37  ;;  %v745_v1 = vpack.c.bf16 %v223_v0, %v222_v63  ;;  %v225_v11 = vld [vmem:[#allocation6 + $0x68] sm:$0xff]  ;;  %v226_v13 = vld [vmem:[#allocation6 + $0x70] sm:$0xff]  ;;  %v227_v14 = vld [vmem:[#allocation6 + $0x78] sm:$0xff]  ;;  %s783_s16 = spop.drf %782 }
 0x114   : > { %704 = vmatpush3.bf16.msra.mxu0 %v701_v28  ;;  %734 = vmatprep.subr.bf16.mxu1 %v733_v43  ;;  %v749_v12 = vpack.c.bf16 %v225_v11, %v224_v10  ;;  %v753_v15 = vpack.c.bf16 %v227_v14, %v226_v13  ;;  %s441_s17 = ssub.s32 0, %s783_s16 }
 0x115   : > { %706 = vmatprep.subr.bf16.mxu0 %v705_v38  ;;  %s1156_s17 = smov (!%p436_p3, %s441_s17), %s783_s16 }
 0x116   : > { %p574_p4 = scmp.lt.s32.totalorder %s1156_s17, 0  ;;  %s447_s18 = sadd.s32 10, %s1156_s17 }
 0x117   : > { %736 = vmatpush3.bf16.msra.mxu1 %v733_v43 }
 0x118   : > { %708 = vmatpush3.bf16.msra.mxu0 %v705_v38  ;;  %738 = vmatprep.subr.bf16.mxu1 %v737_v49  ;;  %s1158_s18 = smov (!%p574_p4, %s447_s18), %s1156_s17 }
 0x119   : > { %710 = vmatprep.subr.bf16.mxu0 %v709_v44  ;;  %p575_p5 = scmp.ne.s32.totalorder %s1158_s18, 0 }
 0x11b   : > { %740 = vmatpush3.bf16.msra.mxu1 %v737_v49 }
 0x11c   : > { %712 = vmatpush3.bf16.msra.mxu0 %v709_v44  ;;  %742 = vmatprep.subr.bf16.mxu1 %v741_v62 }
 0x11d   : > { %714 = vmatprep.subr.bf16.mxu0 %v713_v50 }
 0x11f   : > { %744 = vmatpush3.bf16.msra.mxu1 %v741_v62 }
 0x120   : > { %716 = vmatpush3.bf16.msra.mxu0 %v713_v50  ;;  %746 = vmatprep.subr.bf16.mxu1 %v745_v1 }
 0x121   : > { %718 = vmatprep.subr.bf16.mxu0 %v717_v53 }
 0x123   : > { %748 = vmatpush3.bf16.msra.mxu1 %v745_v1 }
 0x124   : > { %720 = vmatpush3.bf16.msra.mxu0 %v717_v53  ;;  %750 = vmatprep.subr.bf16.mxu1 %v749_v12 }
 0x125   : > { %722 = vmatprep.subr.bf16.mxu0 %v721_v56 }
 0x127   : > { %752 = vmatpush3.bf16.msra.mxu1 %v749_v12 }
 0x128   : > { %724 = vmatpush3.bf16.msra.mxu0 %v721_v56  ;;  %754 = vmatprep.subr.bf16.mxu1 %v753_v15 }
 0x12b   : > { %650 = vmatmul.mubr.f32.vlgmr.msra.gmra.mrb[0].mxu0 %v992_v57  ;;  %756 = vmatpush3.bf16.msra.mxu1 %v753_v15  ;;  %v877_v15 = vmov 0.0  }
 0x12c   : > { %652 = vmatprep.mubr.f32.mxu0 %v994_v58 }
 0x12f   : > { %653 = vmatmul.mubr.f32.gmra.mrb[2].mxu0 %v998_v59 }
 0x189   : > { %v324_v34 = vpop.permute.xlu0 %323  ;;  %v334_v39 = vpop.permute.xlu1 %333 }
 0x18d   : > { %v329_v36 = vpop.permute.xlu0 %328 }
 0x18e   : > { %v339_v48 = vpop.permute.xlu1 %338 }
 0x1fe   : > { %v1007_v17 = vpop.f32.mrb[0].mxu0 }
 0x1ff   : > { %784 = vrcp.f32 %v1007_v17  ;;  %v1010_v18 = vpop.f32.mrb[1].mxu0  ;;  %vm359_vm1 = vcmp.eq.f32.partialorder %v1007_v17, 0.0 }
 0x200   : > { %786 = vrcp.f32 %v1010_v18  ;;  %vm358_vm4 = vcmp.eq.f32.partialorder %v1010_v18, 0.0 }
 0x202   : > { %v1013_v19 = vpop.f32.mrb[2].mxu0 }
 0x203   : > { %788 = vrcp.f32 %v1013_v19  ;;  %v1016_v20 = vpop.f32.mrb[3].mxu0 }
 0x204   : > { %790 = vrcp.f32 %v1016_v20  ;;  %vm360_vm12 = vcmp.eq.f32.partialorder %v1016_v20, 0.0 }
 0x209   : > { %v785_v21 = vpop.eup %784 }
 0x20a   : > { %v787_v22 = vpop.eup %786  ;;  %v207_v24 = vmul.f32 %v785_v21, %v947_v3 }
 0x20b   : > { %v205_v23 = vmul.f32 %v787_v22, %v942_v2 }
 0x20d   : > { %v789_v25 = vpop.eup %788  ;;  %687 = vmatprep.mubr.f32.mxu1 %v205_v23 }
 0x20e   : > { %v791_v26 = vpop.eup %790  ;;  %688 = vmatmul.mubr.f32.vlgmr.msra.gmra.mrb[0].mxu1 %v207_v24  ;;  %v211_v28 = vmul.f32 %v789_v25, %v957_v5 }
 0x20f   : > { %v209_v27 = vmul.f32 %v791_v26, %v952_v4  ;;  %v93_v26 = vld [vmem:[#allocation5] sm:$0xff] }
 0x211   : > { %690 = vmatprep.mubr.f32.mxu1 %v209_v27 }
 0x212   : > { %691 = vmatmul.mubr.f32.gmra.mrb[2].mxu1 %v211_v28 }
 0x2e1   : > { %v1023_v30 = vpop.f32.mrb[0].mxu1 }
 0x2e2   : > { %792 = vlog2.f32 %v1023_v30  ;;  %v1026_v31 = vpop.f32.mrb[1].mxu1 }
 0x2e3   : > { %794 = vlog2.f32 %v1026_v31 }
 0x2e5   : > { %v1029_v32 = vpop.f32.mrb[2].mxu1 }
 0x2e6   : > { %796 = vlog2.f32 %v1029_v32  ;;  %v1032_v33 = vpop.f32.mrb[3].mxu1 }
 0x2e7   : > { %798 = vlog2.f32 %v1032_v33 }
 0x2e8   : > { %800 = vrcp.f32 %v1023_v30 }
 0x2e9   : > { %802 = vrcp.f32 %v1026_v31 }
 0x2ea   : > { %804 = vrcp.f32 %v1032_v33 }
 0x2ec   : > { %v793_v35 = vpop.eup %792 }
 0x2ed   : > { %v316_v37 = vmul.f32 0.6931472, %v793_v35  ;;  %v795_v38 = vpop.eup %794 }
 0x2ee   : > { %v314_v40 = vmul.f32 0.6931472, %v795_v38  ;;  %v428_v38 = vld [vmem:[#allocation4] sm:$0xff] }
 0x2ef   : > { %v342_v41 = vmul.f32 %v329_v36, %v316_v37 }
 0x2f0   : > { %v797_v42 = vpop.eup %796  ;;  %v341_v43 = vmul.f32 %v324_v34, %v314_v40  ;;  %v99_v40 = vld [vmem:[#allocation3] sm:$0xff] }
 0x2f1   : > { %v799_v44 = vpop.eup %798  ;;  %v320_v47 = vmul.f32 0.6931472, %v797_v42  ;;  %v100_v42 = vld [vmem:[#allocation3 + $0x8] sm:$0xff] }
 0x2f2   : > { %v318_v45 = vmul.f32 0.6931472, %v799_v44  ;;  %v345_v46 = vadd.f32 %v342_v41, %v341_v43  ;;  %v801_v54 = vpop.eup %800  ;;  %v101_v43 = vld [vmem:[#allocation3 + $0x10] sm:$0xff]  ;;  %v102_v44 = vld [vmem:[#allocation3 + $0x18] sm:$0xff] }
 0x2f3   : > { %v344_v50 = vmul.f32 %v339_v48, %v320_v47  ;;  %v803_v55 = vpop.eup %802 }
 0x2f4   : > { %v343_v49 = vmul.f32 %v334_v39, %v318_v45  ;;  %v805_v56 = vpop.eup %804 }
 0x2f6   : > { %v346_v51 = vadd.f32 %v345_v46, %v343_v49 }
 0x2f8   : > { %v347_v52 = vadd.f32 %v346_v51, %v344_v50 }
 0x2fa   : > { %v348_v53 = vmul.f32 1.442695, %v347_v52 }
 0x2fc   : > { %806 = vpow2.f32 %v348_v53  ;;  %v508_v53 = vmul.f32 (!%p575_p5), %v1026_v31, %v1026_v31 }
 0x2fd   : > { %808 = vrcp.f32 %v1029_v32 }
 0x306   : > { %v1039_v60 = vpop.eup %806 }
 0x307   : > { %v809_v61 = vpop.eup %808  ;;  %v1042_v62 = vmul.f32 %v1039_v60, %v801_v54  ;;  %v1045_v63 = vmul.f32 %v1039_v60, %v803_v55  ;;  %v1048_v0 = vmul.f32 %v1039_v60, %v805_v56  ;;  %v509_v55 = vmul.f32 (!%p575_p5), %v1023_v30, %v1023_v30 }
 0x308   : > { %v1052_v1 = vmul.f32 %v809_v61, %v1039_v60 }
 0x309   : > { %vm363_vm2 = vcmp.ne.f32.partialorder %v1042_v62, %v1042_v62  ;;  %v371_v10 = vand.u32 2147483647, %v1042_v62  ;;  %vm362_vm3 = vcmp.ne.f32.partialorder %v1045_v63, %v1045_v63  ;;  %v370_v11 = vand.u32 2147483647, %v1045_v63 }
 0x30a   : > { %vm367_vm5 = vmor %vm359_vm1, %vm363_vm2  ;;  %v372_v12 = vand.u32 2147483647, %v1048_v0  ;;  %vm364_vm9 = vcmp.ne.f32.partialorder %v1048_v0, %v1048_v0  ;;  %v373_v14 = vand.u32 2147483647, %v1052_v1  ;;  %vm365_vm14 = vcmp.ne.f32.partialorder %v1052_v1, %v1052_v1 }
 0x30b   : > { %vm375_vm6 = vcmp.eq.f32.partialorder %v371_v10, inf  ;;  %vm366_vm7 = vmor %vm358_vm4, %vm362_vm3  ;;  %vm374_vm8 = vcmp.eq.f32.partialorder %v370_v11, inf  ;;  %vm361_vm1 = vcmp.eq.f32.partialorder %v1013_v19, 0.0  ;;  %v476_v54 = vmul.f32 (!%p575_p5), %v1045_v63, %v1045_v63 }
 0x30c   : > { %vm379_vm10 = vmor %vm367_vm5, %vm375_vm6  ;;  %vm1064_vm11 = vcmp.eq.f32.partialorder %v372_v12, inf  ;;  %vm377_vm4 = vcmp.eq.f32.partialorder %v373_v14, inf  ;;  %vm94_vm6 = vcmp.gt.f32.partialorder %v93_v26, 0.0  ;;  %v477_v56 = vmul.f32 (!%p575_p5), %v1042_v62, %v1042_v62 }
 0x30d   : > { %v568_v17 = vsel %vm379_vm10, 1.0, %v877_v15  ;;  %vm378_vm13 = vmor %vm366_vm7, %vm374_vm8  ;;  %vm878_vm8 = vmmov 1   ;;  %v478_v61 = vmul.f32 (!%p575_p5), %v1048_v0, %v1048_v0  ;;  %v511_v10 = vmul.f32 (!%p575_p5), %v1029_v32, %v1029_v32 }
 0x30e   : > { %392 = vmax.xlane.f32.xlu1 %v568_v17  ;;  %v567_v18 = vsel %vm378_vm13, 1.0, %v877_v15  ;;  %vm368_vm15 = vmor %vm360_vm12, %vm364_vm9  ;;  %v479_v11 = vmul.f32 (!%p575_p5), %v1052_v1, %v1052_v1  ;;  %v454_v12 = vsub.f32 (!%p575_p5), %v1042_v62, %v992_v57  ;;  %v453_v13 = vsub.f32 (!%p575_p5), %v1045_v63, %v989_v29 }
 0x30f   : > { %390 = vmax.xlane.f32.xlu0 %v567_v18  ;;  %vm380_vm2 = vmor %vm368_vm15, %vm1064_vm11  ;;  %v458_v14 = vsub.f32 (!%p575_p5), %v1023_v30, %v100_v42  ;;  %v457_v18 = vsub.f32 (!%p575_p5), %v1026_v31, %v99_v40 }
 0x310   : > { %vm369_vm3 = vmor %vm361_vm1, %vm365_vm14  ;;  %v569_v20 = vsel %vm380_vm2, 1.0, %v877_v15  ;;  %v461_v17 = vmul.f32 (!%p575_p5), %v453_v13, %v453_v13 }
 0x311   : > { %vm381_vm5 = vmor %vm369_vm3, %vm377_vm4 }
 0x312   : > { %v570_v21 = vsel %vm381_vm5, 1.0, %v877_v15 }
 0x313   : > { %394 = vmax.xlane.f32.xlu0 %v569_v20  ;;  %v459_v20 = vsub.f32 (!%p575_p5), %v1032_v33, %v101_v43 }
 0x317   : > { %396 = vmax.xlane.f32.xlu0 %v570_v21  ;;  %v494_v21 = vmul.f32 (!%p575_p5), %v458_v14, %v458_v14 }
 0x39b   : > { %v393_v23 = vpop.xlane.xlu1 %392 }
 0x39c   : > { %v391_v22 = vpop.xlane.xlu0 %390 }
 0x39d   : > { %v398_v25 = vadd.f32 %v393_v23, %v391_v22  ;;  %v493_v22 = vmul.f32 (!%p575_p5), %v457_v18, %v457_v18 }
 0x3a0   : > { %v395_v24 = vpop.xlane.xlu0 %394 }
 0x3a1   : > { %v399_v19 = vadd.f32 %v398_v25, %v395_v24 }
 0x3a4   : > { %v397_v27 = vpop.xlane.xlu0 %396 }
 0x3a5   : > { %v400_v28 = vadd.f32 %v399_v19, %v397_v27 }
 0x3a7   : > { %vm401_vm7 = vcmp.gt.f32.partialorder %v400_v28, 0.0 }
 0x3a8   : > { %vm402_vm9 = vmxor %vm401_vm7, %vm878_vm8 }
 0x3a9   : > { %vm1077_vm10 = vmand %vm94_vm6, %vm402_vm9 }
 0x3aa   : > { %v404_v35 = vsel %vm1077_vm10, 1, %v876_v16  ;;  %v571_v36 = vsel %vm1077_vm10, 1.0, %v877_v15  ;;  %v462_v15 = vmul.f32 (!%p575_p5), %v454_v12, %v454_v12 }
 0x3ab   : > { %430 = vperm.xlu0 %780, %v404_v35   ;;  %vm406_vm11 = vcmp.gt.f32.partialorder %v571_v36, 0.0  ;;  %435 = vst.msk [vmem:[#allocation5] sm:$0xff] %vm61_vm0, %v571_v36 }
 0x3ac   : > { %v407_v37 = vsel %vm406_vm11, 1, %v876_v16 }
 0x3ad   : > { %409 = vperm.xlu1 %781, %v407_v37  }
 0x3ca   : > { %480 = vadd.xlane.f32.xlu0 (!%p575_p5), %v476_v54 }
 0x3ce   : > { %482 = vadd.xlane.f32.xlu0 (!%p575_p5), %v477_v56 }
 0x3d1   : > { %512 = vadd.xlane.f32.xlu1 (!%p575_p5), %v508_v53 }
 0x3d2   : > { %484 = vadd.xlane.f32.xlu0 (!%p575_p5), %v478_v61 }
 0x3d5   : > { %514 = vadd.xlane.f32.xlu1 (!%p575_p5), %v509_v55  ;;  %v879_v55 = vmov (!%p575_p5), 0.0  }
 0x3d6   : > { %486 = vadd.xlane.f32.xlu0 (!%p575_p5), %v479_v11 }
 0x3da   : > { %465 = vadd.xlane.f32.xlu0 (!%p575_p5), %v461_v17 }
 0x3de   : > { %497 = vadd.xlane.f32.xlu0 (!%p575_p5), %v493_v22 }
 0x42a   : > { %v431_v39 = vpop.permute.xlu0 %430 }
 0x42b   : > { %vm432_vm12 = vcmp.eq.s32.totalorder %v431_v39, 1 }
 0x42c   : > { %v433_v41 = vsel %vm432_vm12, %v1039_v60, %v428_v38  ;;  %v410_v45 = vpop.permute.xlu1 %409  ;;  %452 = sbr.rel (%p575_p5) target bundleno = 1242 (0x4da), region = 44  ;;  %v510_v60 = vmul.f32 (!%p575_p5), %v1032_v33, %v1032_v33 }
 0x42d   : > { %434 = vst [vmem:[#allocation4] sm:$0xff] %v433_v41  ;;  %vm411_vm13 = vcmp.eq.s32.totalorder %v410_v45, 1 }
 0x42e   : > { %v412_v16 = vsel %vm411_vm13, %v1045_v63, %v989_v29  ;;  %v413_v46 = vsel %vm411_vm13, %v1042_v62, %v992_v57  ;;  %v414_v47 = vsel %vm411_vm13, %v1048_v0, %v994_v58  ;;  %v415_v48 = vsel %vm411_vm13, %v1052_v1, %v998_v59  ;;  %516 = vadd.xlane.f32.xlu1 (!%p575_p5), %v510_v60 }
 0x42f   : > { %416 = vst [vmem:[#allocation2] sm:$0xff] %v412_v16  ;;  %417 = vst [vmem:[#allocation2 + $0x8] sm:$0xff] %v413_v46  ;;  %v420_v49 = vsel %vm411_vm13, %v1026_v31, %v99_v40  ;;  %v421_v50 = vsel %vm411_vm13, %v1023_v30, %v100_v42  ;;  %v422_v51 = vsel %vm411_vm13, %v1032_v33, %v101_v43 }
 0x430   : > { %418 = vst [vmem:[#allocation2 + $0x10] sm:$0xff] %v414_v47  ;;  %419 = vst [vmem:[#allocation2 + $0x18] sm:$0xff] %v415_v48  ;;  %v423_v52 = vsel %vm411_vm13, %v1029_v32, %v102_v44  ;;  %v455_v57 = vsub.f32 (!%p575_p5), %v1048_v0, %v994_v58  ;;  %v460_v62 = vsub.f32 (!%p575_p5), %v1029_v32, %v102_v44 }
 0x431   : > { %424 = vst [vmem:[#allocation3] sm:$0xff] %v420_v49  ;;  %425 = vst [vmem:[#allocation3 + $0x8] sm:$0xff] %v421_v50  ;;  %v495_v29 = vmul.f32 (!%p575_p5), %v459_v20, %v459_v20  ;;  %v456_v63 = vsub.f32 (!%p575_p5), %v1052_v1, %v998_v59 }
 0x432   : > { %426 = vst [vmem:[#allocation3 + $0x10] sm:$0xff] %v422_v51  ;;  %427 = vst [vmem:[#allocation3 + $0x18] sm:$0xff] %v423_v52  ;;  %518 = vadd.xlane.f32.xlu1 (!%p575_p5), %v511_v10  ;;  %v463_v30 = vmul.f32 (!%p575_p5), %v455_v57, %v455_v57  ;;  %v496_v31 = vmul.f32 (!%p575_p5), %v460_v62, %v460_v62 }
 0x433   : > { %v464_v33 = vmul.f32 %v456_v63, %v456_v63 }
 0x434   : > { %469 = vadd.xlane.f32.xlu0 %v463_v30 }
 0x436   : > { %467 = vadd.xlane.f32.xlu1 %v462_v15 }
 0x438   : > { %471 = vadd.xlane.f32.xlu0 %v464_v33 }
 0x43a   : > { %499 = vadd.xlane.f32.xlu1 %v494_v21 }
 0x43e   : > { %501 = vadd.xlane.f32.xlu1 %v495_v29 }
 0x442   : > { %503 = vadd.xlane.f32.xlu1 %v496_v31 }
 0x457   : > { %v481_v24 = vpop.xlane.xlu0 %480 }
 0x45b   : > { %v483_v19 = vpop.xlane.xlu0 %482 }
 0x45c   : > { %v488_v26 = vadd.f32 %v483_v19, %v481_v24 }
 0x45e   : > { %v513_v23 = vpop.xlane.xlu1 %512 }
 0x45f   : > { %v485_v0 = vpop.xlane.xlu0 %484 }
 0x460   : > { %v489_v36 = vadd.f32 %v488_v26, %v485_v0 }
 0x462   : > { %v515_v25 = vpop.xlane.xlu1 %514 }
 0x463   : > { %v520_v32 = vadd.f32 %v515_v25, %v513_v23  ;;  %v487_v28 = vpop.xlane.xlu0 %486 }
 0x464   : > { %v490_v59 = vadd.f32 %v489_v36, %v487_v28 }
 0x467   : > { %v466_v38 = vpop.xlane.xlu0 %465 }
 0x46b   : > { %v498_v40 = vpop.xlane.xlu0 %497 }
 0x4bb   : > { %v517_v58 = vpop.xlane.xlu1 %516 }
 0x4bc   : > { %v521_v35 = vadd.f32 %v520_v32, %v517_v58 }
 0x4bf   : > { %v519_v27 = vpop.xlane.xlu1 %518 }
 0x4c0   : > { %v522_v37 = vadd.f32 %v521_v35, %v519_v27 }
 0x4c1   : > { %v470_v42 = vpop.xlane.xlu0 %469 }
 0x4c2   : > { %810 = vrcp.f32 %v522_v37 }
 0x4c3   : > { %v468_v1 = vpop.xlane.xlu1 %467  ;;  %812 = vrcp.f32 %v490_v59 }
 0x4c4   : > { %v473_v43 = vadd.f32 %v468_v1, %v466_v38 }
 0x4c5   : > { %v472_v47 = vpop.xlane.xlu0 %471 }
 0x4c6   : > { %v474_v16 = vadd.f32 %v473_v43, %v470_v42 }
 0x4c7   : > { %v500_v39 = vpop.xlane.xlu1 %499 }
 0x4c8   : > { %v505_v44 = vadd.f32 %v500_v39, %v498_v40  ;;  %v475_v50 = vadd.f32 %v474_v16, %v472_v47 }
 0x4cb   : > { %v502_v41 = vpop.xlane.xlu1 %501 }
 0x4cc   : > { %v506_v45 = vadd.f32 %v505_v44, %v502_v41  ;;  %v811_v48 = vpop.eup %810 }
 0x4cd   : > { %v813_v51 = vpop.eup %812 }
 0x4ce   : > { %v492_v53 = vmul.f32 %v813_v51, %v475_v50 }
 0x4cf   : > { %v504_v46 = vpop.xlane.xlu1 %503 }
 0x4d0   : > { %v507_v49 = vadd.f32 %v506_v45, %v504_v46 }
 0x4d2   : > { %v524_v52 = vmul.f32 %v811_v48, %v507_v49 }
 0x4d4   : > { %v525_v54 = vadd.f32 %v524_v52, %v492_v53 }
 0x4d6   : > { %vm526_vm14 = vcmp.gt.f32.partialorder %v525_v54, 1e-09 }
 0x4d7   : > { %vm527_vm15 = vmand %vm1077_vm10, %vm526_vm14 }
 0x4d8   : > { %v576_v56 = vsel %vm527_vm15, 1.0, %v879_v55 }
 0x4d9   : > { %530 = vst.msk [vmem:[#allocation5] sm:$0xff] %vm61_vm0, %v576_v56 }
 0x4da PF: > { %s544_s14 = sadd.s32 1, %s868_s14  }
 0x4db   : > { %p87_p7 = scmp.lt.s32.totalorder %s544_s14, 100 }
 0x4e0   : > { %v531_v60 = vld [vmem:[#allocation5] sm:$0xff] }
 0x4e1   : > { %v532_v61 = vsel %vm61_vm0, %v531_v60, -inf }
 0x4e2   : > { %533 = vmax.xlane.f32.xlu0 %v532_v61 }
 0x56f   : > { %v534_v10 = vpop.xlane.xlu0 %533 }
 0x570   : > { %v535_v11 = vrot.slane %v534_v10, 4 }
 0x572   : > { %v536_v12 = vmax.f32 %v534_v10, %v535_v11 }
 0x574   : > { %v537_v13 = vrot.slane %v536_v12, 2 }
 0x576   : > { %v538_v14 = vmax.f32 %v536_v12, %v537_v13 }
 0x578   : > { %v539_v15 = vrot.slane %v538_v14, 1 }
 0x57a   : > { %v540_v17 = vmax.f32 %v538_v14, %v539_v15 }
 0x57c   : > { %759 = vpush %v540_v17 }
 0x5ad   : > { %s760_s19 = spop %759 }
 0x5ae   : > { %p542_p6 = scmp.gt.f32.partialorder %s760_s19, 0.0 }
 0x5b0   : > { %p89_p8 = pnand %p542_p6, %p87_p7 }
 0x5b2   :  { %92 = sbr.rel (!%p89_p8) target bundleno = 264 (0x108), region = 63 }
 0x5b9 PF:  { %v545_v34 = vld [vmem:[#allocation4] sm:$0xff] }
 0x5ba   :  { %v546_v18 = vld [vmem:[%s1144_s0] sm:$0xff] }
 0x5bb   :  { %v547_v20 = vsub.f32 %v545_v34, %v546_v18 }
 0x5bd   :  { %v548_v21 = vmul.f32 %v547_v20, %v547_v20 }
 0x5bf   :  { %549 = vadd.xlane.f32.xlu0 %v548_v21 }
 0x64c   :  { %v550_v22 = vpop.xlane.xlu0 %549 }
 0x64d   :  { %551 = vst.msk [vmem:[%s1150_s6] sm:$0xff] %vm61_vm0, %v550_v22 }
 0x64e   :  { %556 = vsyncpa [#allocation7], 1 }
 0x64f   :  { %557 = vsyncpa [#allocation9], 1 }

</bundles_post_ra>
